<compile_context>
chip_gen: v5e
topology: v5e:2x2
jax: 0.10.0
libtpu: 0.0.40
codegen_flags: <defaults>
</compile_context>

<pallas_src>
import functools

import jax
import jax.numpy as jnp
from jax.experimental import pallas as pl
from jax.experimental.pallas import tpu as pltpu


_LANE = 128
_SUBLANE = 8
_N_CORES = 2  # leading "parallel" grid axis (both TCs on v7x, serial elsewhere)


def _round_up(x, m):
    return ((x + m - 1) // m) * m


def _l1_partial_kernel(a_ref, b_ref, o_ref, *, total_rows, block_rows,
                       blocks_per_core, n_cores):
    """Accumulates per-core partial sums of |a - b| into an (8,128) slab."""
    c = pl.program_id(0)   # core-split axis ("parallel")
    i = pl.program_id(1)   # row-block index within the core ("arbitrary")

    @pl.when(i == 0)
    def _():
        o_ref[...] = jnp.zeros_like(o_ref)

    diff = jnp.abs(a_ref[...].astype(jnp.float32) - b_ref[...].astype(jnp.float32))

    # Mask rows past the true end of the data (tail block and any clamped /
    # duplicated blocks on the second core). Statically skipped when the grid
    # covers the rows exactly.
    if n_cores * blocks_per_core * block_rows != total_rows:
        row0 = (c * blocks_per_core + i) * block_rows
        row_idx = row0 + jax.lax.broadcasted_iota(jnp.int32, diff.shape, 0)
        diff = jnp.where(row_idx < total_rows, diff, 0.0)

    # Reduce only along the leading (sublane-group) axis: pure VPU vreg adds,
    # no per-step cross-lane reduce and no SMEM scalar dependency chain.
    partial = jnp.sum(diff.reshape(block_rows // _SUBLANE, _SUBLANE, _LANE), axis=0)
    o_ref[0] += partial


@functools.partial(jax.jit, static_argnames=("block_rows",))
def l1_loss_pallas(out, hr, block_rows=1024):
    """Mean absolute error between `out` and `hr` (any matching shapes)."""
    assert out.shape == hr.shape, "out / HR shapes must match"
    n_elems = out.size

    o = out.reshape(-1)   # free bitcast for contiguous inputs (no dtype cast)
    h = hr.reshape(-1)

    # Lane padding only when numel is not a multiple of 128 (pads contribute 0).
    # TODO(synk): handle the ragged <128-element tail without a pad copy.
    pad = (-n_elems) % _LANE
    if pad:
        o = jnp.pad(o, (0, pad))
        h = jnp.pad(h, (0, pad))

    rows = (n_elems + pad) // _LANE
    o2 = o.reshape(rows, _LANE)
    h2 = h.reshape(rows, _LANE)

    # Clamp the tile to the (sublane-rounded) problem size for tiny inputs.
    br = min(block_rows, _round_up(rows, _SUBLANE))
    nb = -(-rows // br)            # total row blocks
    bpc = -(-nb // _N_CORES)       # row blocks handled by each core

    def in_map(c, i):
        # Clamp so the DMA never targets a block past the array end; clamped
        # (duplicated) blocks are fully masked to zero inside the kernel.
        return (jnp.minimum(c * bpc + i, nb - 1), 0)

    kernel = functools.partial(
        _l1_partial_kernel,
        total_rows=rows, block_rows=br, blocks_per_core=bpc, n_cores=_N_CORES)

    partials = pl.pallas_call(
        kernel,
        out_shape=jax.ShapeDtypeStruct((_N_CORES, _SUBLANE, _LANE), jnp.float32),
        grid_spec=pltpu.PrefetchScalarGridSpec(
            num_scalar_prefetch=0,
            grid=(_N_CORES, bpc),
            in_specs=[
                pl.BlockSpec((br, _LANE), in_map),
                pl.BlockSpec((br, _LANE), in_map),
            ],
            out_specs=pl.BlockSpec((1, _SUBLANE, _LANE), lambda c, i: (c, 0, 0)),
        ),
        compiler_params=pltpu.CompilerParams(
            dimension_semantics=("parallel", "arbitrary"),
        ),
    )(o2, h2)

    # Single cross-lane reduce on the tiny (2,8,128) partial slab + mean scaling.
    return jnp.sum(partials) / jnp.float32(n_elems)


class GetLossPallas:
    """JAX/Pallas equivalent of EPIT.get_loss (torch.nn.L1Loss). No parameters."""

    def __init__(self, args=None):
        # torch.nn.L1Loss has no learnable parameters — nothing to initialize.
        pass

    def __call__(self, out, HR, degrade_info=None):
        return l1_loss_pallas(out, HR)


if __name__ == "__main__":
    key = jax.random.PRNGKey(0)
    k1, k2 = jax.random.split(key)

    # small NCHW-shaped SR output / HR target pair
    out = jax.random.normal(k1, (2, 4, 16, 16), dtype=jnp.float32)
    HR = jax.random.normal(k2, (2, 4, 16, 16), dtype=jnp.float32)

    loss_fn = GetLossPallas(args=None)
    loss = loss_fn(out, HR)
    loss = jax.block_until_ready(loss)

    # sanity check against plain-JAX reference (torch L1Loss semantics: mean |out-HR|)
    ref = jnp.mean(jnp.abs(out - HR))
    assert jnp.allclose(loss, ref, rtol=1e-5, atol=1e-6), (loss, ref)

    print("KERNEL_OK")
</pallas_src>

<mosaic_0001>
module attributes {stable_mosaic.version = 11 : i64} {
  func.func @_l1_partial_kernel(%arg0: i32, %arg1: i32, %arg2: memref<16x128xf32, #tpu.memory_space<vmem>>, %arg3: memref<16x128xf32, #tpu.memory_space<vmem>>, %arg4: memref<1x8x128xf32, #tpu.memory_space<vmem>>) attributes {dimension_semantics = [#tpu.dimension_semantics<parallel>, #tpu.dimension_semantics<arbitrary>], iteration_bounds = array<i64: 2, 1>, scalar_prefetch = 0 : i64, scratch_operands = 0 : i64, tpu.core_type = #tpu.core_type<tc>, window_params = [{transform_indices = @transform_0, window_bounds = array<i64: 16, 128>}, {transform_indices = @transform_1, window_bounds = array<i64: 16, 128>}, {transform_indices = @transform_2, window_bounds = array<i64: 1, 8, 128>}]} {
    %c0_i32 = arith.constant 0 : i32
    %0 = arith.cmpi eq, %arg1, %c0_i32 : i32
    %1 = arith.extui %0 : i1 to i32
    %c0_i32_0 = arith.constant 0 : i32
    %2 = arith.cmpi ne, %1, %c0_i32_0 : i32
    scf.if %2 {
      %cst_12 = arith.constant 0.000000e+00 : f32
      %25 = vector.broadcast %cst_12 : f32 to vector<1x8x128xf32>
      %c0_13 = arith.constant 0 : index
      %c0_14 = arith.constant 0 : index
      %c0_15 = arith.constant 0 : index
      %26 = vector.load %arg4[%c0_13, %c0_14, %c0_15] : memref<1x8x128xf32, #tpu.memory_space<vmem>>, vector<1x8x128xf32>
      tpu.vector_store %arg4[%c0_13, %c0_14, %c0_15], %25 {strides = array<i32>} : memref<1x8x128xf32, #tpu.memory_space<vmem>>, vector<1x8x128xf32>,
    } else {
    }
    %c0 = arith.constant 0 : index
    %c0_1 = arith.constant 0 : index
    %3 = vector.load %arg2[%c0, %c0_1] : memref<16x128xf32, #tpu.memory_space<vmem>>, vector<16x128xf32>
    %c0_2 = arith.constant 0 : index
    %c0_3 = arith.constant 0 : index
    %4 = vector.load %arg3[%c0_2, %c0_3] : memref<16x128xf32, #tpu.memory_space<vmem>>, vector<16x128xf32>
    %5 = arith.subf %3, %4 : vector<16x128xf32>
    %6 = math.absf %5 : vector<16x128xf32>
    %c1_i32 = arith.constant 1 : i32
    %7 = arith.muli %arg0, %c1_i32 : i32
    %8 = arith.addi %7, %arg1 : i32
    %c16_i32 = arith.constant 16 : i32
    %9 = arith.muli %8, %c16_i32 : i32
    %10 = tpu.iota {dimensions = array<i32: 0>} : vector<16x128xi32>
    %11 = vector.broadcast %9 : i32 to vector<16x128xi32>
    %12 = arith.addi %11, %10 : vector<16x128xi32>
    %c16_i32_4 = arith.constant 16 : i32
    %13 = vector.broadcast %c16_i32_4 : i32 to vector<16x128xi32>
    %14 = arith.cmpi slt, %12, %13 : vector<16x128xi32>
    %cst = arith.constant 0.000000e+00 : f32
    %15 = vector.broadcast %cst : f32 to vector<16x128xf32>
    %16 = arith.select %14, %6, %15 : vector<16x128xi1>, vector<16x128xf32>
    %17 = vector.shape_cast %16 : vector<16x128xf32> to vector<2x8x128xf32>
    %cst_5 = arith.constant dense<0.000000e+00> : vector<8x128xf32>
    %18 = vector.multi_reduction <add>, %17, %cst_5 [0] : vector<2x8x128xf32> to vector<8x128xf32>
    %c0_6 = arith.constant 0 : index
    %c0_7 = arith.constant 0 : index
    %c0_8 = arith.constant 0 : index
    %19 = vector.load %arg4[%c0_6, %c0_7, %c0_8] : memref<1x8x128xf32, #tpu.memory_space<vmem>>, vector<1x8x128xf32>
    %20 = vector.shape_cast %19 : vector<1x8x128xf32> to vector<8x128xf32>
    %21 = arith.addf %20, %18 : vector<8x128xf32>
    %c0_9 = arith.constant 0 : index
    %c0_10 = arith.constant 0 : index
    %c0_11 = arith.constant 0 : index
    %22 = vector.load %arg4[%c0_9, %c0_10, %c0_11] : memref<1x8x128xf32, #tpu.memory_space<vmem>>, vector<1x8x128xf32>
    %23 = vector.shape_cast %22 : vector<1x8x128xf32> to vector<8x128xf32>
    %24 = vector.shape_cast %21 : vector<8x128xf32> to vector<1x8x128xf32>
    tpu.vector_store %arg4[%c0_9, %c0_10, %c0_11], %24 {strides = array<i32>} : memref<1x8x128xf32, #tpu.memory_space<vmem>>, vector<1x8x128xf32>,
    return
  }
  func.func @transform_0(%arg0: i32, %arg1: i32) -> (i32, i32) {
    %c1_i32 = arith.constant 1 : i32
    %0 = arith.muli %arg0, %c1_i32 : i32
    %1 = arith.addi %0, %arg1 : i32
    %c0_i32 = arith.constant 0 : i32
    %2 = arith.minsi %1, %c0_i32 : i32
    %c0_i32_0 = arith.constant 0 : i32
    %c0_i32_1 = arith.constant 0 : i32
    return %2, %c0_i32_0 : i32, i32
  }
  func.func @transform_1(%arg0: i32, %arg1: i32) -> (i32, i32) {
    %c1_i32 = arith.constant 1 : i32
    %0 = arith.muli %arg0, %c1_i32 : i32
    %1 = arith.addi %0, %arg1 : i32
    %c0_i32 = arith.constant 0 : i32
    %2 = arith.minsi %1, %c0_i32 : i32
    %c0_i32_0 = arith.constant 0 : i32
    %c0_i32_1 = arith.constant 0 : i32
    return %2, %c0_i32_0 : i32, i32
  }
  func.func @transform_2(%arg0: i32, %arg1: i32) -> (i32, i32, i32) {
    %c0_i32 = arith.constant 0 : i32
    %c0_i32_0 = arith.constant 0 : i32
    %c0_i32_1 = arith.constant 0 : i32
    return %arg0, %c0_i32, %c0_i32_0 : i32, i32, i32
  }
}

</mosaic_0001>

<bundles_post_ra>
// kernel: l1_loss_pallas.1
= control target key start
LH: loop header
LB: loop body
LE: loop exit
PB: predicated region body
PF: predicated region fallthrough
CT: control target
= control target key end

     0   :  { %s399_s9 = smov 0   ;;  %s401_s10 = smov 0   ;;  %s435_s0 = inlined_call_operand.vmem [shape: f32[16,128], index: 0, kind: input, shape index: {}]   ;;  %s436_s1 = inlined_call_operand.vmem [shape: f32[16,128], index: 1, kind: input, shape index: {}]   ;;  %s437_s2 = inlined_call_operand.vmem [shape: f32[2,8,128], index: 2, kind: output, shape index: {}]  }
   0x1   :  { %s403_s11 = smov 0  }
   0x2 LB: > { %s24_s12 = sadd.s32 1, %s378_s10  ;;  %p326_p0 = scmp.ge.s32.totalorder %s382_s11, 1  ;;  %s382_s11 = sphi %s403_s11, %s12_s11   ;;  %s378_s10 = sphi %s401_s10, %s439_s10   ;;  %s374_s9 = sphi %s399_s9, %s438_s9  }
   0x3   : > { %p26_p1 = scmp.ge.s32.totalorder %s24_s12, 2  ;;  %p160_p2 = scmp.lt.s32.totalorder %s382_s11, 3 }
   0x5   : > { %s441_s12 = smov (%p26_p1, %s24_s12), 0  ;;  %p161_p3 = pnand %p326_p0, %p160_p2 }
   0x6   : > { %p193_p4 = scmp.lt.s32.totalorder (!%p161_p3), %s374_s9, 0  ;;  %s332_s14 = sshll.u32 (!%p161_p3), %s374_s9, 4 }
   0x7   : > { %164 = sbr.rel (%p161_p3) target bundleno = 30 (0x1e), region = 28  ;;  %p216_p6 = scmp.lt.s32.totalorder (!%p161_p3), %s374_s9, 1 }
   0xc   : > { %v235_v0 = vlaneseq  ;;  %s194_s13 = scalar_select %p193_p4, %s374_s9, 0  ;;  %v238_v3 = vstv %s332_s14 }
   0xd   : > { %s445_s9 = smov (!%p216_p6, %s374_s9), 1 }
   0xe   : > { %v236_v1 = vshrl.u32 %v235_v0, 7  ;;  %s327_s15 = sshll.u32 %s194_s13, 1  ;;  %s331_s23 = sshll.u32 %s445_s9, 3 }
   0xf   : > { %p196_p5 = scmp.lt.s32.totalorder %s327_s15, 1  ;;  %s219_s26 = scalar_lea.vmem %s437_s2, %s331_s23 }
  0x10   : > { %v237_v2 = vadd.s32 8, %v236_v1  ;;  %v239_v4 = vadd.s32 %v238_v3, %v236_v1 }
  0x11   : > { %s443_s15 = smov (!%p196_p5, %s327_s15), 1 }
  0x12   : > { %s328_s16 = sshll.u32 %s443_s15, 3  ;;  %v240_v5 = vadd.s32 %v238_v3, %v237_v2  ;;  %vm241_vm0 = vcmp.lt.s32.totalorder %v239_v4, 16 }
  0x13   : > { %s199_s19 = scalar_lea.vmem %s435_s0, %s328_s16  ;;  %s211_s22 = scalar_lea.vmem %s436_s1, %s328_s16 }
  0x14   : > { %v225_v6 = vld [vmem:[%s199_s19] sm:$0xff]  ;;  %v226_v7 = vld [vmem:[%s199_s19 + $0x8] sm:$0xff]  ;;  %vm242_vm1 = vcmp.lt.s32.totalorder %v240_v5, 16 }
  0x15   : > { %v227_v8 = vld [vmem:[%s211_s22] sm:$0xff]  ;;  %v228_v9 = vld [vmem:[%s211_s22 + $0x8] sm:$0xff] }
  0x16   : > { %v229_v10 = vsub.f32 %v225_v6, %v227_v8  ;;  %v230_v11 = vsub.f32 %v226_v7, %v228_v9 }
  0x18   : > { %v231_v12 = vand.u32 2147483647, %v229_v10  ;;  %v232_v13 = vand.u32 2147483647, %v230_v11 }
  0x1a   : > { %v243_v14 = vsel %vm241_vm0, %v231_v12, 0.0  ;;  %v244_v15 = vsel %vm242_vm1, %v232_v13, 0.0 }
  0x1b   : > { %v245_v16 = vadd.f32 %v244_v15, %v243_v14 }
  0x1d   : > { %248 = vst [vmem:[%s219_s26] sm:$0xff] %v245_v16 }
  0x1e PF: > { %s12_s11 = sadd.s32 1, %s382_s11   ;;  %s438_s9 = smov %s378_s10 }
  0x1f   : > { %p9_p7 = scmp.ge.s32.totalorder %s12_s11, 4   ;;  %s439_s10 = smov %s441_s12 }
  0x21   :  { %11 = sbr.rel (!%p9_p7) target bundleno = 2 (0x2), region = 65 }

</bundles_post_ra>
